<compile_context>
chip_gen: v6e
topology: v6e:2x2x1
jax: 0.10.0
libtpu: 0.0.40
codegen_flags: <defaults>
</compile_context>

<pallas_src>
import jax
import jax.numpy as jnp
from jax.experimental import pallas as pl
from jax.experimental.pallas import tpu as pltpu

_LANE_CANDIDATES = (4096, 2048, 1024, 512, 256, 128)   # widest lane-dense first
_VMEM_LIMIT_BYTES = 48 * 1024 * 1024


def _make_fts_kernel(compute_dtype, approx_recip):
    cdt = jnp.dtype(compute_dtype)

    def kernel(x_ref, o_ref):
        x = x_ref[...].astype(cdt)
        one = jnp.asarray(1.0, cdt)
        zero = jnp.asarray(0.0, cdt)
        # Note: exp(-x) overflows to +inf for very negative x; reciprocal(inf)=0
        # and the where() zeroes that branch anyway -> matches the reference.
        sig = pl.reciprocal(one + jnp.exp(-x), approx=approx_recip)
        o_ref[...] = jnp.where(x >= zero, x * sig, zero).astype(o_ref.dtype)

    return kernel


def _fts_jnp(x):
    """Plain-JAX reference / tiny-tail fallback."""
    xf = x.astype(jnp.float32)
    return jnp.where(xf >= 0.0, xf / (1.0 + jnp.exp(-xf)), 0.0).astype(x.dtype)


def _round_up(v, q):
    return -(-v // q) * q


def _pick_block_rows(rows, last, itemsize, sublanes, target_block_bytes):
    """Rows per block: ~target bytes, a multiple of the dtype sublane quantum,
    and small enough that the grid has >= 2 steps when the tensor allows it
    (keeps both v7x TensorCores streaming)."""
    if rows <= sublanes:
        return rows                       # single full-extent block
    cap = max(sublanes,
              (target_block_bytes // (last * itemsize)) // sublanes * sublanes)
    tr = min(cap, max(sublanes, rows // sublanes * sublanes))
    if rows >= 2 * sublanes:
        half = _round_up(_round_up(rows, 2) // 2, sublanes)
        tr = min(tr, half)
    return tr


def _fts_2d(x2d, compute_dtype, approx_recip, tr):
    rows, last = x2d.shape
    itemsize = jnp.dtype(x2d.dtype).itemsize
    return pl.pallas_call(
        _make_fts_kernel(compute_dtype, approx_recip),
        out_shape=jax.ShapeDtypeStruct((rows, last), x2d.dtype),
        grid_spec=pltpu.PrefetchScalarGridSpec(
            num_scalar_prefetch=0,
            grid=(pl.cdiv(rows, tr),),            # partial last block is masked
            in_specs=[pl.BlockSpec((tr, last), lambda i: (i, 0))],
            out_specs=pl.BlockSpec((tr, last), lambda i: (i, 0)),
        ),
        compiler_params=pltpu.CompilerParams(
            dimension_semantics=("parallel",),
            vmem_limit_bytes=_VMEM_LIMIT_BYTES,
        ),
        cost_estimate=pl.CostEstimate(
            flops=4 * rows * last,
            transcendentals=rows * last,
            bytes_accessed=2 * rows * last * itemsize,
        ),
    )(x2d)


def fts(x: jax.Array, *, target_block_bytes: int = 4 * 1024 * 1024) -> jax.Array:
    """Apply FTS elementwise to an array of any shape."""
    orig_shape = x.shape
    dtype = x.dtype
    n = x.size
    if n == 0:
        return x

    itemsize = jnp.dtype(dtype).itemsize
    sublanes = max(8, 32 // itemsize)     # 8 for f32, 16 for bf16, 32 for int8/fp8

    if dtype == jnp.bfloat16:
        compute_dtype, approx_recip = jnp.bfloat16, True   # bf16 EUP on v6e/v7x
    else:
        compute_dtype, approx_recip = jnp.float32, False   # exact path (and v5e)

    flat = jnp.ravel(x)

    # Widest lane-dense last dim that divides n exactly (no pad/copy needed).
    last = next((c for c in _LANE_CANDIDATES if n % c == 0), None)

    if last is not None:
        rows = n // last
        tr = _pick_block_rows(rows, last, itemsize, sublanes, target_block_bytes)
        out = _fts_2d(flat.reshape(rows, last), compute_dtype, approx_recip, tr)
        return out.reshape(orig_shape)

    # Ragged size: run the kernel on the lane-aligned bulk and compute the
    # short (< sublanes*128-element) tail in plain jnp.  One concat instead of
    # the old pad + slice-back double round trip over the full tensor.
    unit = sublanes * 128
    bulk_n = (n // unit) * unit
    if bulk_n == 0:
        # TODO(synk): tensors smaller than one vreg tile stay in plain jnp.
        return _fts_jnp(flat).reshape(orig_shape)

    last = next(c for c in _LANE_CANDIDATES if bulk_n % c == 0)
    rows = bulk_n // last
    tr = _pick_block_rows(rows, last, itemsize, sublanes, target_block_bytes)
    bulk_out = _fts_2d(flat[:bulk_n].reshape(rows, last),
                       compute_dtype, approx_recip, tr)
    tail_out = _fts_jnp(flat[bulk_n:])
    return jnp.concatenate([bulk_out.reshape(-1), tail_out]).reshape(orig_shape)


if __name__ == "__main__":
    key = jax.random.PRNGKey(0)
    # Input shape mirroring a typical NCHW activation tensor.
    x = jax.random.normal(key, (2, 4, 16, 16), dtype=jnp.float32)

    y = fts(x)
    jax.block_until_ready(y)

    y_ref = _fts_jnp(x)
    assert y.shape == x.shape and y.dtype == x.dtype
    assert jnp.allclose(y, y_ref, atol=1e-6, rtol=1e-5), "mismatch vs reference"

    print("KERNEL_OK")
</pallas_src>

<mosaic_0001>
module attributes {stable_mosaic.version = 11 : i64} {
  func.func @kernel(%arg0: i32, %arg1: memref<1x2048xf32, #tpu.memory_space<vmem>>, %arg2: memref<1x2048xf32, #tpu.memory_space<vmem>>) attributes {dimension_semantics = [#tpu.dimension_semantics<parallel>], iteration_bounds = array<i64: 1>, scalar_prefetch = 0 : i64, scratch_operands = 0 : i64, tpu.core_type = #tpu.core_type<tc>, window_params = [{transform_indices = @transform_0, window_bounds = array<i64: 1, 2048>}, {transform_indices = @transform_1, window_bounds = array<i64: 1, 2048>}]} {
    %c0 = arith.constant 0 : index
    %c0_0 = arith.constant 0 : index
    %0 = vector.load %arg1[%c0, %c0_0] : memref<1x2048xf32, #tpu.memory_space<vmem>>, vector<1x2048xf32>
    %cst = arith.constant 0.000000e+00 : f32
    %1 = vector.broadcast %cst : f32 to vector<1x2048xf32>
    %2 = arith.subf %1, %0 : vector<1x2048xf32>
    %3 = math.exp %2 : vector<1x2048xf32>
    %cst_1 = arith.constant 1.000000e+00 : f32
    %4 = vector.broadcast %cst_1 : f32 to vector<1x2048xf32>
    %5 = arith.addf %4, %3 : vector<1x2048xf32>
    %6 = tpu.reciprocal %5 : vector<1x2048xf32> -> vector<1x2048xf32>
    %cst_2 = arith.constant 0.000000e+00 : f32
    %7 = vector.broadcast %cst_2 : f32 to vector<1x2048xf32>
    %8 = arith.cmpf oge, %0, %7 : vector<1x2048xf32>
    %9 = arith.mulf %0, %6 : vector<1x2048xf32>
    %cst_3 = arith.constant 0.000000e+00 : f32
    %10 = vector.broadcast %cst_3 : f32 to vector<1x2048xf32>
    %11 = arith.select %8, %9, %10 : vector<1x2048xi1>, vector<1x2048xf32>
    %c0_4 = arith.constant 0 : index
    %c0_5 = arith.constant 0 : index
    %12 = vector.load %arg2[%c0_4, %c0_5] : memref<1x2048xf32, #tpu.memory_space<vmem>>, vector<1x2048xf32>
    tpu.vector_store %arg2[%c0_4, %c0_5], %11 {strides = array<i32>} : memref<1x2048xf32, #tpu.memory_space<vmem>>, vector<1x2048xf32>,
    return
  }
  func.func @transform_0(%arg0: i32) -> (i32, i32) {
    %c0_i32 = arith.constant 0 : i32
    %c0_i32_0 = arith.constant 0 : i32
    return %arg0, %c0_i32 : i32, i32
  }
  func.func @transform_1(%arg0: i32) -> (i32, i32) {
    %c0_i32 = arith.constant 0 : i32
    %c0_i32_0 = arith.constant 0 : i32
    return %arg0, %c0_i32 : i32, i32
  }
}

</mosaic_0001>

<bundles_post_ra>
// kernel: tpu_custom_call.1
= control target key start
LH: loop header
LB: loop body
LE: loop exit
PB: predicated region body
PF: predicated region fallthrough
CT: control target
= control target key end

     0   :  { %6 = vsyncpa [#allocation3], 0  ;;  %s128_s0 = inlined_call_operand.hbm [shape: f32[1,2048], index: 0, kind: input, shape index: {}]   ;;  %s129_s1 = inlined_call_operand.hbm [shape: f32[1,2048], index: 1, kind: output, shape index: {}]  }
   0x1   :  { %7 = vsyncpa [#allocation4], 0  ;;  %s110_s6 = smov [#allocation2]  }
   0x2   :  { %s14_s7 = sshll.u32 %s110_s6, 4  ;;  %s15_s7 = int_to_ptr.vmem [resolvable:$true] %s14_s7 }
   0x3   :  { %s74_s8 = scalar_lea.vmem %s15_s7, 256  ;;  %p79_p1 = scmp.lt.s32.totalorder %s15_s7, %s15_s7 }
   0x4   :  { %p75_p0 = scmp.ne.s32.totalorder %s15_s7, %s74_s8  ;;  %p80_p2 = scmp.lt.s32.totalorder %s74_s8, %s74_s8 }
   0x6   :  { %p81_p3 = por %p80_p2, %p79_p1 }
   0x8   :  { %p82_p4 = pnand %p81_p3, %p75_p0 }
   0xa   :  { %85 = shalt.err (!%p82_p4)
}
   0xb   :  { %17 = dma.hbm_to_vmem [thread:$0]  %s128_s0, 256, %s15_s7, [#allocation3]  }
   0xc   :  { %106 = dma.done.wait [#allocation3], 256  }
   0xd   :  { %107 = vsyncadd [#allocation3], 4294967040  ;;  %v21_v0 = vld [vmem:[#allocation2] sm:$0xff]  ;;  %v22_v1 = vld [vmem:[#allocation2 + $0x8] sm:$0xff]  ;;  %s111_s11 = smov [#allocation5]  }
   0xe   :  { %v23_v2 = vsub.f32 0.0, %v21_v0  ;;  %v24_v3 = vsub.f32 0.0, %v22_v1  ;;  %vm33_vm0 = vcmp.ge.f32.partialorder %v21_v0, 0.0  ;;  %s47_s0 = sshll.u32 %s111_s11, 4  ;;  %vm34_vm1 = vcmp.ge.f32.partialorder %v22_v1, 0.0  ;;  %s48_s0 = int_to_ptr.vmem [resolvable:$true] %s47_s0 }
   0xf   :  { %s86_s12 = scalar_lea.vmem %s48_s0, 256  ;;  %p91_p6 = scmp.lt.s32.totalorder %s48_s0, %s48_s0 }
  0x10   :  { %v25_v4 = vmul.f32 1.442695, %v23_v2  ;;  %v27_v5 = vmul.f32 1.442695, %v24_v3  ;;  %p87_p5 = scmp.ne.s32.totalorder %s48_s0, %s86_s12  ;;  %p92_p7 = scmp.lt.s32.totalorder %s86_s12, %s86_s12 }
  0x12   :  { %58 = vpow2.f32 %v25_v4  ;;  %p93_p8 = por %p92_p7, %p91_p6 }
  0x13   :  { %60 = vpow2.f32 %v27_v5 }
  0x14   :  { %p94_p9 = pnand %p93_p8, %p87_p5 }
  0x1f   :  { %v59_v6 = vpop.eup %58 }
  0x20   :  { %v61_v7 = vpop.eup %60  ;;  %v29_v8 = vadd.f32 1.0, %v59_v6 }
  0x21   :  { %v30_v9 = vadd.f32 1.0, %v61_v7 }
  0x22   :  { %62 = vrcp.f32 %v29_v8 }
  0x23   :  { %64 = vrcp.f32 %v30_v9 }
  0x2f   :  { %v63_v10 = vpop.eup %62 }
  0x30   :  { %v65_v11 = vpop.eup %64  ;;  %v35_v12 = vmul.f32 %v63_v10, %v21_v0 }
  0x31   :  { %v36_v13 = vmul.f32 %v65_v11, %v22_v1 }
  0x32   :  { %v37_v14 = vsel %vm33_vm0, %v35_v12, 0.0 }
  0x33   :  { %39 = vst [vmem:[#allocation5] sm:$0xff] %v37_v14  ;;  %v38_v15 = vsel %vm34_vm1, %v36_v13, 0.0 }
  0x34   :  { %40 = vst [vmem:[#allocation5 + $0x8] sm:$0xff] %v38_v15 }
  0x35   :  { %97 = shalt.err (!%p94_p9)
}
  0x36   :  { %50 = dma.vmem_to_hbm [thread:$0]  %s48_s0, 256, %s129_s1, [#allocation4]  }
  0x37   :  { %108 = dma.done.wait [#allocation4], 256  }
  0x38   :  { %109 = vsyncadd [#allocation4], 4294967040 }
  0x39   :  { %54 = vsyncpa [#allocation3], 1 }
  0x3a   :  { %55 = vsyncpa [#allocation4], 1 }

</bundles_post_ra>
